<compile_context>
chip_gen: v7x
topology: tpu7x:2x2x1
jax: 0.10.0
libtpu: 0.0.40
codegen_flags: <defaults>
</compile_context>

<pallas_src>
import functools

import jax
import jax.numpy as jnp
from jax.experimental import pallas as pl
from jax.experimental.pallas import tpu as pltpu


def _round_up(x, m):
    return (x + m - 1) // m * m


def _calc_output_size(insize, kernel, stride=1, padding=0):
    return (insize + 2 * padding - (kernel - 1) - 1 + stride) // stride


# --------------------------------------------------------------------------
# Tiling plan (static, computed once per layer at init)
# --------------------------------------------------------------------------
_MAX_SINGLE_K = 4096                    # single-K-step cap (elements)
_MAX_W_TILE_ELEMS = 4 * 1024 * 1024     # bf16 weight tile <= 8 MiB (16 MiB dbl-buffered)


def _plan_kn(K, N):
    """Choose padded dims and tile sizes for a (K, N) weight matrix."""
    Kp = _round_up(K, 128)
    if Kp <= _MAX_SINGLE_K:
        tk = Kp                         # single K grid step -> no accumulator
    else:
        tk = 2048
        Kp = _round_up(Kp, tk)
    Np = _round_up(N, 128)
    tn = Np if Np <= 2048 else 2048
    while tk * tn > _MAX_W_TILE_ELEMS and tn > 128:
        tn = max(128, _round_up(tn // 2, 128))
    Np = _round_up(Np, tn)
    return Kp, Np, tk, tn


def _prep_linear(w, b):
    """w: (K, N) f32, b: (N,) f32 -> padded bf16 weight + f32 bias + static plan.

    Done once at init so the forward pass never re-pads / re-copies weights.
    """
    K, N = w.shape
    Kp, Np, tk, tn = _plan_kn(K, N)
    wp = jnp.zeros((Kp, Np), jnp.bfloat16).at[:K, :N].set(w.astype(jnp.bfloat16))
    bp = jnp.zeros((1, Np), jnp.float32).at[0, :N].set(b)
    return {"w": wp, "b": bp, "K": K, "N": N, "tk": tk, "tn": tn}


# --------------------------------------------------------------------------
# Fused (A [*dropout_mask] @ W + b) [+ ReLU] tiled matmul kernel
# --------------------------------------------------------------------------
def _mm_kernel(*refs, relu, nk, dropout):
    if dropout:
        a_ref, d_ref, w_ref, b_ref, o_ref = refs[:5]
        scratch = refs[5:]
    else:
        a_ref, w_ref, b_ref, o_ref = refs[:4]
        scratch = refs[4:]

    a = a_ref[...]
    if dropout:
        a = a * d_ref[...]              # mask already contains the 1/(1-p) scale

    if nk == 1:
        # Single K step: no accumulator scratch, write the output tile directly.
        r = jnp.dot(a, w_ref[...], preferred_element_type=jnp.float32) + b_ref[...]
        if relu:
            r = jnp.maximum(r, 0.0)
        o_ref[...] = r.astype(o_ref.dtype)
        return

    acc_ref = scratch[0]

    @pl.when(pl.program_id(2) == 0)
    def _():
        acc_ref[...] = jnp.zeros_like(acc_ref)

    acc_ref[...] += jnp.dot(a, w_ref[...], preferred_element_type=jnp.float32)

    @pl.when(pl.program_id(2) == pl.num_programs(2) - 1)
    def _():
        r = acc_ref[...] + b_ref[...]
        if relu:
            r = jnp.maximum(r, 0.0)
        o_ref[...] = r.astype(o_ref.dtype)


def matmul_bias(a, layer, relu=False, drop=None):
    """a: (M, K) float; layer: prepared dict; drop: optional (M, K) mask*scale."""
    M, K = a.shape
    assert K == layer["K"], (K, layer["K"])
    w_p, b_p = layer["w"], layer["b"]
    Kp, Np = w_p.shape
    tk, tn, N = layer["tk"], layer["tn"], layer["N"]

    Mp = _round_up(M, 8)
    nj = Np // tn
    nk = Kp // tk
    tm = Mp
    if nj == 1 and nk == 1 and Mp % 16 == 0:
        tm = Mp // 2                    # >=2 parallel tiles so v7x's 2nd core has work
    ni = Mp // tm

    def pad_act(v):
        v = v.astype(jnp.bfloat16)
        if (M, K) != (Mp, Kp):
            v = jnp.zeros((Mp, Kp), jnp.bfloat16).at[:M, :K].set(v)
        return v

    has_drop = drop is not None
    inputs = [pad_act(a)]
    if has_drop:
        inputs.append(pad_act(drop))
    inputs += [w_p, b_p]

    if nk == 1:
        a_spec = pl.BlockSpec((tm, tk), lambda i, j: (i, 0))
        w_spec = pl.BlockSpec((tk, tn), lambda i, j: (0, j))
        b_spec = pl.BlockSpec((1, tn), lambda i, j: (0, j))
        o_spec = pl.BlockSpec((tm, tn), lambda i, j: (i, j))
        grid = (ni, nj)
        sem = ("parallel", "parallel")
        scratch = []
    else:
        a_spec = pl.BlockSpec((tm, tk), lambda i, j, k: (i, k))
        w_spec = pl.BlockSpec((tk, tn), lambda i, j, k: (k, j))
        b_spec = pl.BlockSpec((1, tn), lambda i, j, k: (0, j))
        o_spec = pl.BlockSpec((tm, tn), lambda i, j, k: (i, j))
        grid = (ni, nj, nk)
        sem = ("parallel", "parallel", "arbitrary")
        scratch = [pltpu.VMEM((tm, tn), jnp.float32)]

    in_specs = [a_spec] + ([a_spec] if has_drop else []) + [w_spec, b_spec]

    out = pl.pallas_call(
        functools.partial(_mm_kernel, relu=relu, nk=nk, dropout=has_drop),
        out_shape=jax.ShapeDtypeStruct((Mp, Np), jnp.float32),
        grid_spec=pltpu.PrefetchScalarGridSpec(
            num_scalar_prefetch=0,
            grid=grid,
            in_specs=in_specs,
            out_specs=o_spec,
            scratch_shapes=scratch),
        compiler_params=pltpu.CompilerParams(
            dimension_semantics=sem,
            vmem_limit_bytes=32 * 1024 * 1024),
    )(*inputs)
    return out[:M, :N]


# --------------------------------------------------------------------------
# MaxPool2d(kernel_size=2): elementwise max of the 4 window corners,
# presented to the kernel as lane-dense (rows, OW*C) slabs.
# --------------------------------------------------------------------------
def _max4_kernel(a_ref, b_ref, c_ref, d_ref, o_ref):
    o_ref[...] = jnp.maximum(jnp.maximum(a_ref[...], b_ref[...]),
                             jnp.maximum(c_ref[...], d_ref[...]))


def maxpool2x2(x):
    # x: (N, H, W, C), stride 2, floor mode (PyTorch default)
    N, H, W, C = x.shape
    OH, OW = H // 2, W // 2
    xs = x[:, :2 * OH, :2 * OW, :]
    # lane-dense views: last dim OW*C >= 512 here -> unmasked full-lane loads/stores
    views = [xs[:, di::2, dj::2, :].reshape(N * OH, OW * C)
             for di in (0, 1) for dj in (0, 1)]
    vmem = pl.BlockSpec(memory_space=pltpu.MemorySpace.VMEM)
    # TODO(synk): add a row grid before scaling to larger batch/resolution (whole
    # arrays fit VMEM comfortably at these sizes).
    out = pl.pallas_call(
        _max4_kernel,
        out_shape=jax.ShapeDtypeStruct((N * OH, OW * C), x.dtype),
        in_specs=[vmem] * 4,
        out_specs=vmem,
    )(*views)
    return out.reshape(N, OH, OW, C)


# --------------------------------------------------------------------------
# Dropout (p=0.5, F.dropout's training=True default): keep-mask generated with
# jax.random host-side (the TPU in-kernel PRNG has no interpret-mode lowering)
# and fused into the consuming matmul kernel.
# --------------------------------------------------------------------------
def dropout_scale_mask(key, shape, p=0.5):
    keep = jax.random.bernoulli(key, 1.0 - p, shape)
    return keep.astype(jnp.bfloat16) * (1.0 / (1.0 - p))


# --------------------------------------------------------------------------
# Convolution = im2col (JAX glue) + Pallas fused matmul+bias+ReLU
# --------------------------------------------------------------------------
def _im2col(x, kh, kw, stride, padding):
    if padding:
        x = jnp.pad(x, ((0, 0), (padding, padding), (padding, padding), (0, 0)))
    N, Hp, Wp, C = x.shape
    oh = (Hp - kh) // stride + 1
    ow = (Wp - kw) // stride + 1
    cols = []
    for i in range(kh):
        for j in range(kw):
            cols.append(x[:, i:i + stride * oh:stride, j:j + stride * ow:stride, :])
    patches = jnp.stack(cols, axis=3)            # (N, oh, ow, kh*kw, C)
    return patches.reshape(N * oh * ow, kh * kw * C), oh, ow


def conv2d_relu(x, layer, stride=1, padding=0):
    # x: (N,H,W,C); layer holds the pre-reshaped/padded bf16 weight matrix.
    # TODO(synk): fold the kh*kw taps into the matmul grid to skip materializing
    # im2col patches -- minor traffic at 32x32 input.
    N = x.shape[0]
    patches, oh, ow = _im2col(x, layer["kh"], layer["kw"], stride, padding)
    out = matmul_bias(patches, layer, relu=True)
    return out.reshape(N, oh, ow, layer["N"])


# --------------------------------------------------------------------------
# AlexNet_32 parameters + forward
# --------------------------------------------------------------------------
def init_params(key, num_classes, size_input):
    C, H, W = size_input
    H, W = _calc_output_size(H, 3, 2, 1), _calc_output_size(W, 3, 2, 1)   # conv1
    H, W = _calc_output_size(H, 2, 2), _calc_output_size(W, 2, 2)         # pool1
    H, W = _calc_output_size(H, 2, 1, 1), _calc_output_size(W, 2, 1, 1)   # conv2
    H, W = _calc_output_size(H, 2, 2), _calc_output_size(W, 2, 2)         # pool2
    H, W = _calc_output_size(H, 3, 1, 1), _calc_output_size(W, 3, 1, 1)   # conv3
    H, W = _calc_output_size(H, 3, 1, 1), _calc_output_size(W, 3, 1, 1)   # conv4
    H, W = _calc_output_size(H, 3, 1, 1), _calc_output_size(W, 3, 1, 1)   # conv5
    H, W = _calc_output_size(H, 2, 2), _calc_output_size(W, 2, 2)         # pool3
    flat = 256 * H * W

    keys = jax.random.split(key, 16)
    s = 0.05

    def conv(kw_, kb_, kh, kwid, cin, cout):
        w = jax.random.normal(kw_, (kh, kwid, cin, cout), jnp.float32) * s
        b = jax.random.normal(kb_, (cout,), jnp.float32) * s
        layer = _prep_linear(w.reshape(kh * kwid * cin, cout), b)
        layer.update(kh=kh, kw=kwid, cin=cin)
        return layer

    # fc1: generated in torch NCHW-flatten row order, then permuted ONCE to
    # NHWC-flatten order so the forward pass flattens the NHWC activation with
    # a free reshape (no transpose at runtime).
    fc1_w = jax.random.normal(keys[10], (flat, 4096), jnp.float32) * s
    fc1_w = fc1_w.reshape(256, H, W, 4096).transpose(1, 2, 0, 3).reshape(flat, 4096)
    fc1_b = jax.random.normal(keys[11], (4096,), jnp.float32) * s

    fc2_w = jax.random.normal(keys[12], (4096, 4096), jnp.float32) * s
    fc2_b = jax.random.normal(keys[13], (4096,), jnp.float32) * s
    fc3_w = jax.random.normal(keys[14], (4096, num_classes), jnp.float32) * s
    fc3_b = jax.random.normal(keys[15], (num_classes,), jnp.float32) * s

    return {
        "conv1": conv(keys[0], keys[1], 3, 3, C, 64),
        "conv2": conv(keys[2], keys[3], 2, 2, 64, 192),
        "conv3": conv(keys[4], keys[5], 3, 3, 192, 384),
        "conv4": conv(keys[6], keys[7], 3, 3, 384, 256),
        "conv5": conv(keys[8], keys[9], 3, 3, 256, 256),
        "fc1": _prep_linear(fc1_w, fc1_b),
        "fc2": _prep_linear(fc2_w, fc2_b),
        "fc3": _prep_linear(fc3_w, fc3_b),
    }


def alexnet32_forward(params, x_nchw, dropout_key=None):
    # x_nchw: (N, C, H, W) float32  (PyTorch layout at the boundary)
    # Dropout is active (matches F.dropout's training=True default in the spec);
    # masks are deterministic given dropout_key.
    if dropout_key is None:
        dropout_key = jax.random.PRNGKey(0)
    N = x_nchw.shape[0]
    x = jnp.transpose(x_nchw, (0, 2, 3, 1))                    # -> NHWC
    x = conv2d_relu(x, params["conv1"], stride=2, padding=1)
    x = maxpool2x2(x)
    x = conv2d_relu(x, params["conv2"], stride=1, padding=1)
    x = maxpool2x2(x)
    x = conv2d_relu(x, params["conv3"], stride=1, padding=1)
    x = conv2d_relu(x, params["conv4"], stride=1, padding=1)
    x = conv2d_relu(x, params["conv5"], stride=1, padding=1)
    x = maxpool2x2(x)
    # NHWC flatten; fc1's weight rows were permuted at init to match this order.
    x = x.reshape(N, -1)
    k1, k2 = jax.random.split(dropout_key)
    x = matmul_bias(x, params["fc1"], relu=True, drop=dropout_scale_mask(k1, x.shape))
    x = matmul_bias(x, params["fc2"], relu=True, drop=dropout_scale_mask(k2, x.shape))
    x = matmul_bias(x, params["fc3"], relu=False)
    return x


if __name__ == "__main__":
    num_classes = 10
    size_input = (3, 32, 32)       # AlexNet_32 -> 32x32 RGB input
    batch = 2

    key = jax.random.PRNGKey(0)
    k_param, k_x, k_drop = jax.random.split(key, 3)
    params = init_params(k_param, num_classes, size_input)
    x = jax.random.normal(k_x, (batch,) + size_input, jnp.float32)

    out = alexnet32_forward(params, x, dropout_key=k_drop)
    out = jax.block_until_ready(out)
    assert out.shape == (batch, num_classes), out.shape
    assert bool(jnp.all(jnp.isfinite(out)))
    print("KERNEL_OK")
</pallas_src>

<mosaic_0001>
module attributes {stable_mosaic.version = 11 : i64} {
  func.func @_mm_kernel(%arg0: i32, %arg1: i32, %arg2: memref<256x128xbf16, #tpu.memory_space<vmem>>, %arg3: memref<128x128xbf16, #tpu.memory_space<vmem>>, %arg4: memref<1x128xf32, #tpu.memory_space<vmem>>, %arg5: memref<256x128xf32, #tpu.memory_space<vmem>>) attributes {dimension_semantics = [#tpu.dimension_semantics<parallel>, #tpu.dimension_semantics<parallel>], iteration_bounds = array<i64: 2, 1>, scalar_prefetch = 0 : i64, scratch_operands = 0 : i64, tpu.core_type = #tpu.core_type<tc>, window_params = [{transform_indices = @transform_0, window_bounds = array<i64: 256, 128>}, {transform_indices = @transform_1, window_bounds = array<i64: 128, 128>}, {transform_indices = @transform_2, window_bounds = array<i64: 1, 128>}, {transform_indices = @transform_3, window_bounds = array<i64: 256, 128>}]} {
    %c0 = arith.constant 0 : index
    %c0_0 = arith.constant 0 : index
    %0 = vector.load %arg2[%c0, %c0_0] : memref<256x128xbf16, #tpu.memory_space<vmem>>, vector<256x128xbf16>
    %c0_1 = arith.constant 0 : index
    %c0_2 = arith.constant 0 : index
    %1 = vector.load %arg3[%c0_1, %c0_2] : memref<128x128xbf16, #tpu.memory_space<vmem>>, vector<128x128xbf16>
    %cst = arith.constant dense<0.000000e+00> : vector<256x128xf32>
    %2 = tpu.matmul %0, %1, %cst {dimension_numbers = #tpu.dot_dimension_numbers<[1], [0], [0], [1], [0, 0, 1, 1], [], []>} : vector<256x128xbf16>, vector<128x128xbf16>, vector<256x128xf32> -> vector<256x128xf32>
    %c0_3 = arith.constant 0 : index
    %c0_4 = arith.constant 0 : index
    %3 = vector.load %arg4[%c0_3, %c0_4] : memref<1x128xf32, #tpu.memory_space<vmem>>, vector<1x128xf32>
    %4 = vector.broadcast %3 : vector<1x128xf32> to vector<256x128xf32>
    %5 = arith.addf %2, %4 : vector<256x128xf32>
    %cst_5 = arith.constant 0.000000e+00 : f32
    %6 = vector.broadcast %cst_5 : f32 to vector<256x128xf32>
    %7 = arith.maximumf %5, %6 : vector<256x128xf32>
    %c0_6 = arith.constant 0 : index
    %c0_7 = arith.constant 0 : index
    %8 = vector.load %arg5[%c0_6, %c0_7] : memref<256x128xf32, #tpu.memory_space<vmem>>, vector<256x128xf32>
    tpu.vector_store %arg5[%c0_6, %c0_7], %7 {strides = array<i32>} : memref<256x128xf32, #tpu.memory_space<vmem>>, vector<256x128xf32>,
    return
  }
  func.func @transform_0(%arg0: i32, %arg1: i32) -> (i32, i32) {
    %c0_i32 = arith.constant 0 : i32
    %c0_i32_0 = arith.constant 0 : i32
    return %arg0, %c0_i32 : i32, i32
  }
  func.func @transform_1(%arg0: i32, %arg1: i32) -> (i32, i32) {
    %c0_i32 = arith.constant 0 : i32
    %c0_i32_0 = arith.constant 0 : i32
    return %c0_i32, %arg1 : i32, i32
  }
  func.func @transform_2(%arg0: i32, %arg1: i32) -> (i32, i32) {
    %c0_i32 = arith.constant 0 : i32
    %c0_i32_0 = arith.constant 0 : i32
    return %c0_i32, %arg1 : i32, i32
  }
  func.func @transform_3(%arg0: i32, %arg1: i32) -> (i32, i32) {
    %c0_i32 = arith.constant 0 : i32
    return %arg0, %arg1 : i32, i32
  }
}

</mosaic_0001>

<bundles_post_ra>
// kernel: tpu_custom_call.1
= control target key start
LH: loop header
LB: loop body
LE: loop exit
PB: predicated region body
PF: predicated region fallthrough
CT: control target
= control target key end

     0   :  { %8 = vsyncpa [#allocation3], 0  ;;  %s1511_s0 = inlined_call_operand.hbm [shape: bf16[512,128], index: 0, kind: input, shape index: {}]   ;;  %s1512_s1 = inlined_call_operand.hbm [shape: bf16[128,128], index: 1, kind: input, shape index: {}]   ;;  %s1513_s2 = inlined_call_operand.vmem [shape: f32[1,128], index: 2, kind: input, shape index: {}]   ;;  %s1514_s3 = inlined_call_operand.hbm [shape: f32[512,128], index: 3, kind: output, shape index: {}]  }
   0x1   :  { %10 = vsyncpa [#allocation3 + $0x1], 0 }
   0x2   :  { %11 = vsyncpa [#allocation6], 0 }
   0x3   :  { %12 = vsyncpa [#allocation4], 0 }
   0x4   :  { %14 = vsyncpa [#allocation4 + $0x1], 0  ;;  %s1195_s12 = smov 0   ;;  %s1197_s13 = smov 0  }
   0x5   :  { %s1199_s14 = smov 0   ;;  %s1201_s15 = smov 0  }
   0x6   :  { %s1203_s16 = smov 0   ;;  %s1205_s17 = smov 0  }
   0x7 LB: > { %s788_s18 = sadd.s32 4294967295, %s1166_s17   ;;  %s789_s19 = sadd.s32 4294967294, %s1166_s17   ;;  %s1166_s17 = sphi %s1205_s17, %s20_s17   ;;  %s1162_s16 = sphi %s1203_s16, %s1538_s16   ;;  %s1158_s15 = sphi %s1201_s15, %s1537_s15   ;;  %s1154_s14 = sphi %s1199_s14, %s1536_s14   ;;  %s1150_s13 = sphi %s1197_s13, %s1535_s13   ;;  %s1146_s12 = sphi %s1195_s12, %s1534_s12  }
   0x8   : > { %p52_p0 = scmp.ne.s32.totalorder %s1150_s13, %s1146_s12  ;;  %p1229_p1 = scmp.eq.s32.totalorder %s788_s18, 0 }
   0x9   : > { %p1233_p2 = scmp.eq.s32.totalorder %s788_s18, 1  ;;  %p136_p3 = scmp.eq.s32.totalorder %s789_s19, 1 }
   0xa   : > { %s1519_s20 = scalar_select %p1229_p1, 1, 0 }
   0xb   : > { %s1520_s21 = scalar_select %p1233_p2, 1, 0 }
   0xc   : > { %p1239_p4 = por %p1229_p1, %p52_p0  ;;  %p790_p5 = scmp.ge.s32.totalorder %s1166_s17, 1 }
   0xd   : > { %p1244_p6 = por %p136_p3, %p52_p0  ;;  %p143_p7 = scmp.lt.s32.totalorder %s1166_s17, 3 }
   0xe   : > { %s1521_s22 = scalar_select %p1239_p4, 1, 0 }
   0xf   : > { %s1522_s23 = scalar_select %p1244_p6, 1, 0 }
  0x10   : > { %p1249_p8 = pnand %p790_p5, %p143_p7  ;;  %s1168_s25 = smov [#allocation5]  }
  0x11   : > { %s157_s26 = sshll.u32 %s1168_s25, 4  ;;  %s32_s28 = sadd.s32 1, %s1162_s16  ;;  %s158_s26 = int_to_ptr.vmem [resolvable:$true] %s157_s26 }
  0x12   : > { %s1523_s24 = scalar_select %p1249_p8, 1, 0 }
  0x13   : > { %p929_p9 = pneg %p1249_p8  ;;  %s1022_s4 = scalar_lea.hbm %s1512_s1, 1024 }
  0x14   : > { %p1023_p12 = scmp.ne.s32.totalorder %s1512_s1, %s1022_s4  ;;  %p1029_p5 = scmp.lt.u32.totalorder %s1022_s4, %s1512_s1 }
  0x15   : > { %p1258_p11 = pnand %p929_p9, %p1229_p1 }
  0x17   : > { %p1024_p13 = pneg %p1258_p11 }
  0x19   : > { %p1025_p0 = pnand %p1024_p13, %p1023_p12 }
  0x1b   : > { %p1026_p3 = pneg %p1025_p0 }
  0x1d   : > { %p1031_p7 = pnand %p1029_p5, %p1026_p3 }
  0x1f   : > { %1034 = shalt.err (!%p1031_p7)
}
  0x20   : > { %s1035_s9 = scalar_lea.vmem %s158_s26, 1024  ;;  %p1043_p1 = scmp.lt.s32.totalorder %s158_s26, %s158_s26 }
  0x21   : > { %p1036_p9 = scmp.ne.s32.totalorder %s158_s26, %s1035_s9  ;;  %p1044_p4 = scmp.lt.s32.totalorder %s1035_s9, %s1035_s9 }
  0x23   : > { %p1038_p10 = pnand %p1036_p9, %p1024_p13  ;;  %p1045_p8 = por %p1044_p4, %p1043_p1 }
  0x25   : > { %p1039_p6 = pneg %p1038_p10 }
  0x27   : > { %p1046_p2 = pnand %p1045_p8, %p1039_p6 }
  0x29   : > { %1049 = shalt.err (!%p1046_p2)
}
  0x2a   : > { %s1169_s10 = smov 64   ;;  %s1170_s11 = smov 4  }
  0x2b   : > { %932 = dma.hbm_to_vmem [thread:$0]  (!%p1258_p11), %s1512_s1, 1024, %s158_s26, [#allocation6], %s1169_s10, %s1169_s10, %s1170_s11  }
  0x2c   : > { %p34_p1 = scmp.ge.s32.totalorder %s32_s28, 2  ;;  %s39_s25 = sadd.s32 1, %s1154_s14 }
  0x2d   : > { %p46_p2 = scmp.ne.s32.totalorder %s1154_s14, %s1150_s13  ;;  %p47_p4 = scmp.eq.s32.totalorder %s1166_s17, 0 }
  0x2e   : > { %s1540_s28 = smov (%p34_p1, %s32_s28), 0  ;;  %p1526_p8 = scmp.ne.s32.totalorder %s1520_s21, 0 }
  0x2f   : > { %p1288_p6 = por %p47_p4, %p46_p2  ;;  %s36_s30 = ssub.s32 %s1162_s16, %s1540_s28 }
  0x30   : > { %p1294_p10 = por %p1526_p8, %p46_p2  ;;  %p942_p12 = scmp.lt.s32.totalorder %s1166_s17, 2 }
  0x31   : > { %p37_p11 = scmp.eq.s32.totalorder %s36_s30, 0  ;;  %s177_s26 = sand.u32 1, %s1154_s14  }
  0x32   : > { %s794_s4 = sshll.u32 %s177_s26, 7  ;;  %s831_s6 = sshll.u32 %s1162_s16, 11 }
  0x33   : > { %s1303_s5 = scalar_select %p37_p11, %s1154_s14, %s39_s25  }
  0x34   : > { %s1309_s9 = scalar_lea.hbm %s1511_s0, %s831_s6  ;;  %s181_s21 = scalar_lea.vmem [#allocation2], %s794_s4 }
  0x35   : > { %s188_s18 = sshll.u32 %s181_s21, 4  ;;  %p1315_p13 = pnand %p942_p12, %p1288_p6  ;;  %s1311_s18 = int_to_ptr.vmem [resolvable:$true] %s188_s18 }
  0x36   : > { %s1319_s25 = scalar_lea.sflag [#allocation3], %s177_s26  ;;  %s1050_s30 = scalar_lea.hbm %s1309_s9, 2048 }
  0x37   : > { %p1051_p0 = scmp.ne.s32.totalorder %s1309_s9, %s1050_s30  ;;  %p1052_p3 = pneg %p1315_p13 }
  0x38   : > { %s1055_s29 = scalar_lea.hbm %s1511_s0, 4096  ;;  %p1056_p9 = scmp.lt.u32.totalorder %s1309_s9, %s1511_s0 }
  0x39   : > { %p1053_p5 = pnand %p1052_p3, %p1051_p0  ;;  %p1057_p1 = scmp.lt.u32.totalorder %s1055_s29, %s1050_s30 }
  0x3a   : > { %p1059_p4 = scmp.lt.u32.totalorder %s1050_s30, %s1309_s9 }
  0x3b   : > { %p1054_p7 = pneg %p1053_p5  ;;  %p1058_p2 = por %p1057_p1, %p1056_p9 }
  0x3d   : > { %p1060_p6 = por %p1059_p4, %p1058_p2 }
  0x3f   : > { %p1061_p8 = pnand %p1060_p6, %p1054_p7 }
  0x41   : > { %1064 = shalt.err (!%p1061_p8)
}
  0x42   : > { %s1065_s26 = scalar_lea.vmem %s1311_s18, 2048  ;;  %s1171_s21 = smov [#allocation2]  }
  0x43   : > { %p1066_p12 = scmp.ne.s32.totalorder %s1311_s18, %s1065_s26  ;;  %s1070_s4 = sshll.u32 %s1171_s21, 4  ;;  %s1071_s4 = int_to_ptr.vmem [resolvable:$false] %s1070_s4 }
  0x44   : > { %s1072_s6 = scalar_lea.vmem %s1071_s4, 4096  ;;  %p1073_p5 = scmp.lt.s32.totalorder %s1311_s18, %s1071_s4 }
  0x45   : > { %p1068_p11 = pnand %p1066_p12, %p1052_p3  ;;  %p1074_p9 = scmp.lt.s32.totalorder %s1072_s6, %s1065_s26 }
  0x47   : > { %p1069_p0 = pneg %p1068_p11  ;;  %p1075_p1 = por %p1074_p9, %p1073_p5 }
  0x49   : > { %p1076_p2 = pnand %p1075_p1, %p1069_p0 }
  0x4b   : > { %1079 = shalt.err (!%p1076_p2)
}
  0x4c   : > { %936 = dma.hbm_to_vmem [thread:$0]  (!%p1315_p13), %s1309_s9, 2048, %s1311_s18, %s1319_s25, %s1169_s10, %s1169_s10, %s1170_s11  }
  0x4d   : > { %p1529_p3 = scmp.ne.s32.totalorder %s1523_s24, 0 }
  0x4e   : > { %s1353_s30 = sand.u32 (!%p1529_p3), 1, %s1150_s13   ;;  %p1530_p7 = scmp.ne.s32.totalorder (!%p1529_p3), %s1521_s22, 0 }
  0x4f   : > { %200 = sbr.rel (%p1529_p3) target bundleno = 381 (0x17d), region = 32  ;;  %s798_s29 = sshll.u32 (!%p1529_p3), %s1353_s30, 7 }
  0x50   : > { %s203_s7 = scalar_lea.sflag (!%p1529_p3), [#allocation3], %s1353_s30  ;;  %s1357_s8 = scalar_lea.vmem (!%p1529_p3), [#allocation2], %s798_s29 }
  0x56   : > { %1133 = dma.done.wait (%p1530_p7), %s203_s7, 2048  }
  0x57   : > { %1135 = vsyncadd (%p1530_p7), %s203_s7, 4294965248  ;;  %p1531_p13 = scmp.ne.s32.totalorder %s1519_s20, 0 }
  0x59   : > { %1137 = dma.done.wait (%p1531_p13), [#allocation6], 1024  }
  0x5a   : > { %1139 = vsyncadd (%p1531_p13), [#allocation6], 4294966272  ;;  %v998_v0 = vld [vmem:[#allocation5] sm:$0xff]   ;;  %v999_v1 = vld [vmem:[#allocation5 + $0x8] sm:$0xff]   ;;  %s800_s24 = sshll.u32 %s1353_s30, 8  ;;  %s832_s11 = sshll.u32 %s1158_s15, 12 }
  0x5b   : > { %857 = vmatprep.subr.bf16.mxu0 %v998_v0  ;;  %905 = vmatprep.subr.bf16.mxu1 %v998_v0  ;;  %v1000_v2 = vld [vmem:[#allocation5 + $0x10] sm:$0xff]   ;;  %v1001_v3 = vld [vmem:[#allocation5 + $0x18] sm:$0xff]   ;;  %v1006_v4 = vld [vmem:[%s1357_s8] sm:$0xff]   ;;  %s1397_s10 = scalar_lea.vmem [#allocation7], %s800_s24  ;;  %s1454_s19 = scalar_lea.hbm %s1514_s3, %s832_s11 }
  0x5c   : > { %858 = vmatpush3.bf16.msra.mxu0 %v998_v0  ;;  %913 = vmatpush3.bf16.msra.mxu1 %v998_v0  ;;  %v1007_v5 = vld [vmem:[%s1357_s8 + $0x40] sm:$0xff]   ;;  %v1003_v7 = vld [vmem:[#allocation5 + $0x28] sm:$0xff]   ;;  %v1004_v8 = vld [vmem:[#allocation5 + $0x30] sm:$0xff]   ;;  %s681_s9 = sshll.u32 %s1397_s10, 4  ;;  %s667_s25 = scalar_lea.sflag [#allocation4], %s1353_s30  ;;  %s1456_s9 = int_to_ptr.vmem [resolvable:$true] %s681_s9 }
  0x5d   : > { %859 = vmatprep.subr.bf16.mxu0 %v999_v1  ;;  %906 = vmatprep.subr.bf16.mxu1 %v999_v1  ;;  %v1002_v6 = vld [vmem:[#allocation5 + $0x20] sm:$0xff]   ;;  %v1005_v9 = vld [vmem:[#allocation5 + $0x38] sm:$0xff]   ;;  %v1008_v10 = vld [vmem:[%s1357_s8 + $0x8] sm:$0xff]   ;;  %s1080_s26 = scalar_lea.vmem %s1456_s9, 4096  ;;  %s1172_s21 = smov [#allocation7]  }
  0x5e   : > { %873 = vmatprep.mubr.bf16.mxu0 %v1006_v4  ;;  %889 = vmatprep.mubr.bf16.mxu1 %v1007_v5  ;;  %v1009_v11 = vld [vmem:[%s1357_s8 + $0x48] sm:$0xff]   ;;  %v1010_v12 = vld [vmem:[%s1357_s8 + $0x10] sm:$0xff]   ;;  %v1012_v14 = vld [vmem:[%s1357_s8 + $0x18] sm:$0xff]   ;;  %p1081_p4 = scmp.ne.s32.totalorder %s1456_s9, %s1080_s26  ;;  %s1084_s4 = sshll.u32 %s1172_s21, 4  ;;  %s1085_s4 = int_to_ptr.vmem [resolvable:$false] %s1084_s4 }
  0x5f   : > { %v1011_v13 = vld [vmem:[%s1357_s8 + $0x50] sm:$0xff]   ;;  %v1013_v15 = vld [vmem:[%s1357_s8 + $0x58] sm:$0xff]   ;;  %v1014_v16 = vld [vmem:[%s1357_s8 + $0x20] sm:$0xff]   ;;  %s1086_s6 = scalar_lea.vmem %s1085_s4, 8192  ;;  %p1087_p12 = scmp.lt.s32.totalorder %s1456_s9, %s1085_s4 }
  0x60   : > { %860 = vmatpush3.bf16.msra.mxu0 %v999_v1  ;;  %914 = vmatpush3.bf16.msra.mxu1 %v999_v1  ;;  %v1015_v17 = vld [vmem:[%s1357_s8 + $0x60] sm:$0xff]   ;;  %v1016_v18 = vld [vmem:[%s1357_s8 + $0x28] sm:$0xff]   ;;  %v1018_v20 = vld [vmem:[%s1357_s8 + $0x30] sm:$0xff]   ;;  %p1082_p6 = pnand %p1081_p4, %p1294_p10  ;;  %p1088_p11 = scmp.lt.s32.totalorder %s1086_s6, %s1080_s26 }
  0x61   : > { %861 = vmatprep.subr.bf16.mxu0 %v1000_v2  ;;  %907 = vmatprep.subr.bf16.mxu1 %v1000_v2  ;;  %v1017_v19 = vld [vmem:[%s1357_s8 + $0x68] sm:$0xff]   ;;  %v1019_v21 = vld [vmem:[%s1357_s8 + $0x70] sm:$0xff]   ;;  %v1020_v22 = vld [vmem:[%s1357_s8 + $0x38] sm:$0xff]  }
  0x62   : > { %v1021_v23 = vld [vmem:[%s1357_s8 + $0x78] sm:$0xff]   ;;  %v1386_v24 = vld [vmem:[%s1513_s2] ss:$0 sm:$0xff]  ;;  %p1083_p8 = pneg %p1082_p6  ;;  %p1089_p0 = por %p1088_p11, %p1087_p12 }
  0x64   : > { %862 = vmatpush3.bf16.msra.mxu0 %v1000_v2  ;;  %915 = vmatpush3.bf16.msra.mxu1 %v1000_v2  ;;  %p1090_p5 = pnand %p1089_p0, %p1083_p8 }
  0x65   : > { %863 = vmatprep.subr.bf16.mxu0 %v1001_v3  ;;  %908 = vmatprep.subr.bf16.mxu1 %v1001_v3 }
  0x68   : > { %864 = vmatpush3.bf16.msra.mxu0 %v1001_v3  ;;  %916 = vmatpush3.bf16.msra.mxu1 %v1001_v3 }
  0x69   : > { %865 = vmatprep.subr.bf16.mxu0 %v1002_v6  ;;  %909 = vmatprep.subr.bf16.mxu1 %v1002_v6 }
  0x6c   : > { %866 = vmatpush3.bf16.msra.mxu0 %v1002_v6  ;;  %917 = vmatpush3.bf16.msra.mxu1 %v1002_v6 }
  0x6d   : > { %867 = vmatprep.subr.bf16.mxu0 %v1003_v7  ;;  %910 = vmatprep.subr.bf16.mxu1 %v1003_v7 }
  0x70   : > { %868 = vmatpush3.bf16.msra.mxu0 %v1003_v7  ;;  %918 = vmatpush3.bf16.msra.mxu1 %v1003_v7 }
  0x71   : > { %869 = vmatprep.subr.bf16.mxu0 %v1004_v8  ;;  %911 = vmatprep.subr.bf16.mxu1 %v1004_v8 }
  0x74   : > { %870 = vmatpush3.bf16.msra.mxu0 %v1004_v8  ;;  %919 = vmatpush3.bf16.msra.mxu1 %v1004_v8 }
  0x75   : > { %871 = vmatprep.subr.bf16.mxu0 %v1005_v9  ;;  %912 = vmatprep.subr.bf16.mxu1 %v1005_v9 }
  0x78   : > { %872 = vmatpush3.bf16.msra.mxu0 %v1005_v9  ;;  %920 = vmatpush3.bf16.msra.mxu1 %v1005_v9 }
  0x7b   : > { %874 = vmatmul.mubr.bf16.vlgmr.msra.gmra.mrb[0].mxu0 %v1008_v10  ;;  %890 = vmatmul.mubr.bf16.vlgmr.msra.gmra.mrb[0].mxu1 %v1009_v11 }
  0x7c   : > { %877 = vmatprep.mubr.bf16.mxu0 %v1010_v12  ;;  %893 = vmatprep.mubr.bf16.mxu1 %v1011_v13 }
  0x83   : > { %878 = vmatmul.mubr.bf16.gmra.mrb[4].mxu0 %v1012_v14  ;;  %894 = vmatmul.mubr.bf16.gmra.mrb[4].mxu1 %v1013_v15 }
  0x84   : > { %881 = vmatprep.mubr.bf16.mxu0 %v1014_v16  ;;  %897 = vmatprep.mubr.bf16.mxu1 %v1015_v17 }
  0x8b   : > { %882 = vmatmul.mubr.bf16.gmra.mrb[8].mxu0 %v1016_v18  ;;  %898 = vmatmul.mubr.bf16.gmra.mrb[8].mxu1 %v1017_v19 }
  0x8c   : > { %885 = vmatprep.mubr.bf16.mxu0 %v1018_v20  ;;  %901 = vmatprep.mubr.bf16.mxu1 %v1019_v21 }
  0x93   : > { %886 = vmatmul.mubr.bf16.gmra.mrb[12].mxu0 %v1020_v22  ;;  %902 = vmatmul.mubr.bf16.gmra.mrb[12].mxu1 %v1021_v23 }
 0x14e   : > { %v875_v25 = vpop.f32.mrb[0].mxu0  ;;  %v891_v26 = vpop.f32.mrb[0].mxu1 }
 0x14f   : > { %v484_v27 = vadd.f32 %v875_v25, %v1386_v24  ;;  %v548_v28 = vadd.f32 %v891_v26, %v1386_v24  ;;  %v475_v29 = vpop.f32.mrb[1].mxu0  ;;  %v539_v30 = vpop.f32.mrb[1].mxu1 }
 0x150   : > { %v476_v31 = vadd.f32 %v1386_v24, %v475_v29  ;;  %v540_v32 = vadd.f32 %v1386_v24, %v539_v30  ;;  %v876_v33 = vpop.f32.mrb[2].mxu0  ;;  %v892_v34 = vpop.f32.mrb[2].mxu1 }
 0x151   : > { %v604_v35 = vmax.f32 %v484_v27, 0.0  ;;  %v620_v36 = vmax.f32 %v548_v28, 0.0  ;;  %v487_v37 = vadd.f32 %v876_v33, %v1386_v24  ;;  %v551_v38 = vadd.f32 %v892_v34, %v1386_v24  ;;  %v478_v39 = vpop.f32.mrb[3].mxu0  ;;  %v542_v40 = vpop.f32.mrb[3].mxu1 }
 0x152   : > { %v602_v41 = vmax.f32 %v476_v31, 0.0  ;;  %v618_v42 = vmax.f32 %v540_v32, 0.0  ;;  %v479_v43 = vadd.f32 %v1386_v24, %v478_v39  ;;  %v543_v44 = vadd.f32 %v1386_v24, %v542_v40 }
 0x153   : > { %636 = vst [vmem:[%s1397_s10 + $0x10] sm:$0xff] %v604_v35  ;;  %652 = vst [vmem:[%s1397_s10 + $0x90] sm:$0xff] %v620_v36  ;;  %v605_v45 = vmax.f32 %v487_v37, 0.0  ;;  %v621_v46 = vmax.f32 %v551_v38, 0.0 }
 0x154   : > { %634 = vst [vmem:[%s1397_s10] sm:$0xff] %v602_v41  ;;  %650 = vst [vmem:[%s1397_s10 + $0x80] sm:$0xff] %v618_v42  ;;  %v603_v47 = vmax.f32 %v479_v43, 0.0  ;;  %v619_v48 = vmax.f32 %v543_v44, 0.0 }
 0x155   : > { %637 = vst [vmem:[%s1397_s10 + $0x18] sm:$0xff] %v605_v45  ;;  %653 = vst [vmem:[%s1397_s10 + $0x98] sm:$0xff] %v621_v46 }
 0x156   : > { %635 = vst [vmem:[%s1397_s10 + $0x8] sm:$0xff] %v603_v47  ;;  %651 = vst [vmem:[%s1397_s10 + $0x88] sm:$0xff] %v619_v48  ;;  %v879_v49 = vpop.f32.mrb[4].mxu0  ;;  %v895_v50 = vpop.f32.mrb[4].mxu1 }
 0x157   : > { %v500_v51 = vadd.f32 %v879_v49, %v1386_v24  ;;  %v564_v52 = vadd.f32 %v895_v50, %v1386_v24  ;;  %v491_v53 = vpop.f32.mrb[5].mxu0  ;;  %v555_v54 = vpop.f32.mrb[5].mxu1 }
 0x158   : > { %v492_v55 = vadd.f32 %v1386_v24, %v491_v53  ;;  %v556_v56 = vadd.f32 %v1386_v24, %v555_v54  ;;  %v880_v57 = vpop.f32.mrb[6].mxu0  ;;  %v896_v58 = vpop.f32.mrb[6].mxu1 }
 0x159   : > { %v608_v59 = vmax.f32 %v500_v51, 0.0  ;;  %v624_v60 = vmax.f32 %v564_v52, 0.0  ;;  %v503_v61 = vadd.f32 %v880_v57, %v1386_v24  ;;  %v567_v62 = vadd.f32 %v896_v58, %v1386_v24  ;;  %v494_v63 = vpop.f32.mrb[7].mxu0  ;;  %v558_v0 = vpop.f32.mrb[7].mxu1 }
 0x15a   : > { %v606_v1 = vmax.f32 %v492_v55, 0.0  ;;  %v622_v2 = vmax.f32 %v556_v56, 0.0  ;;  %v495_v3 = vadd.f32 %v1386_v24, %v494_v63  ;;  %v559_v4 = vadd.f32 %v1386_v24, %v558_v0 }
 0x15b   : > { %640 = vst [vmem:[%s1397_s10 + $0x30] sm:$0xff] %v608_v59  ;;  %656 = vst [vmem:[%s1397_s10 + $0xb0] sm:$0xff] %v624_v60  ;;  %v609_v5 = vmax.f32 %v503_v61, 0.0  ;;  %v625_v6 = vmax.f32 %v567_v62, 0.0 }
 0x15c   : > { %638 = vst [vmem:[%s1397_s10 + $0x20] sm:$0xff] %v606_v1  ;;  %654 = vst [vmem:[%s1397_s10 + $0xa0] sm:$0xff] %v622_v2  ;;  %v607_v7 = vmax.f32 %v495_v3, 0.0  ;;  %v623_v8 = vmax.f32 %v559_v4, 0.0 }
 0x15d   : > { %641 = vst [vmem:[%s1397_s10 + $0x38] sm:$0xff] %v609_v5  ;;  %657 = vst [vmem:[%s1397_s10 + $0xb8] sm:$0xff] %v625_v6 }
 0x15e   : > { %639 = vst [vmem:[%s1397_s10 + $0x28] sm:$0xff] %v607_v7  ;;  %655 = vst [vmem:[%s1397_s10 + $0xa8] sm:$0xff] %v623_v8  ;;  %v883_v9 = vpop.f32.mrb[8].mxu0  ;;  %v899_v10 = vpop.f32.mrb[8].mxu1 }
 0x15f   : > { %v516_v11 = vadd.f32 %v883_v9, %v1386_v24  ;;  %v580_v12 = vadd.f32 %v899_v10, %v1386_v24  ;;  %v507_v13 = vpop.f32.mrb[9].mxu0  ;;  %v571_v14 = vpop.f32.mrb[9].mxu1 }
 0x160   : > { %v508_v15 = vadd.f32 %v1386_v24, %v507_v13  ;;  %v572_v16 = vadd.f32 %v1386_v24, %v571_v14  ;;  %v884_v17 = vpop.f32.mrb[10].mxu0  ;;  %v900_v18 = vpop.f32.mrb[10].mxu1 }
 0x161   : > { %v612_v19 = vmax.f32 %v516_v11, 0.0  ;;  %v628_v20 = vmax.f32 %v580_v12, 0.0  ;;  %v519_v21 = vadd.f32 %v884_v17, %v1386_v24  ;;  %v583_v22 = vadd.f32 %v900_v18, %v1386_v24  ;;  %v510_v23 = vpop.f32.mrb[11].mxu0  ;;  %v574_v25 = vpop.f32.mrb[11].mxu1 }
 0x162   : > { %v610_v26 = vmax.f32 %v508_v15, 0.0  ;;  %v626_v27 = vmax.f32 %v572_v16, 0.0  ;;  %v511_v28 = vadd.f32 %v1386_v24, %v510_v23  ;;  %v575_v29 = vadd.f32 %v1386_v24, %v574_v25 }
 0x163   : > { %644 = vst [vmem:[%s1397_s10 + $0x50] sm:$0xff] %v612_v19  ;;  %660 = vst [vmem:[%s1397_s10 + $0xd0] sm:$0xff] %v628_v20  ;;  %v613_v30 = vmax.f32 %v519_v21, 0.0  ;;  %v629_v31 = vmax.f32 %v583_v22, 0.0 }
 0x164   : > { %642 = vst [vmem:[%s1397_s10 + $0x40] sm:$0xff] %v610_v26  ;;  %658 = vst [vmem:[%s1397_s10 + $0xc0] sm:$0xff] %v626_v27  ;;  %v611_v32 = vmax.f32 %v511_v28, 0.0  ;;  %v627_v33 = vmax.f32 %v575_v29, 0.0 }
 0x165   : > { %645 = vst [vmem:[%s1397_s10 + $0x58] sm:$0xff] %v613_v30  ;;  %661 = vst [vmem:[%s1397_s10 + $0xd8] sm:$0xff] %v629_v31 }
 0x166   : > { %643 = vst [vmem:[%s1397_s10 + $0x48] sm:$0xff] %v611_v32  ;;  %659 = vst [vmem:[%s1397_s10 + $0xc8] sm:$0xff] %v627_v33  ;;  %v887_v34 = vpop.f32.mrb[12].mxu0  ;;  %v903_v35 = vpop.f32.mrb[12].mxu1 }
 0x167   : > { %v532_v36 = vadd.f32 %v887_v34, %v1386_v24  ;;  %v596_v37 = vadd.f32 %v903_v35, %v1386_v24  ;;  %v523_v38 = vpop.f32.mrb[13].mxu0  ;;  %v587_v39 = vpop.f32.mrb[13].mxu1 }
 0x168   : > { %v524_v40 = vadd.f32 %v1386_v24, %v523_v38  ;;  %v588_v41 = vadd.f32 %v1386_v24, %v587_v39  ;;  %v888_v42 = vpop.f32.mrb[14].mxu0  ;;  %v904_v43 = vpop.f32.mrb[14].mxu1 }
 0x169   : > { %v616_v44 = vmax.f32 %v532_v36, 0.0  ;;  %v632_v45 = vmax.f32 %v596_v37, 0.0  ;;  %v535_v46 = vadd.f32 %v888_v42, %v1386_v24  ;;  %v599_v47 = vadd.f32 %v904_v43, %v1386_v24  ;;  %v526_v48 = vpop.f32.mrb[15].mxu0  ;;  %v590_v49 = vpop.f32.mrb[15].mxu1 }
 0x16a   : > { %v614_v50 = vmax.f32 %v524_v40, 0.0  ;;  %v630_v51 = vmax.f32 %v588_v41, 0.0  ;;  %v527_v52 = vadd.f32 %v1386_v24, %v526_v48  ;;  %v591_v53 = vadd.f32 %v1386_v24, %v590_v49 }
 0x16b   : > { %648 = vst [vmem:[%s1397_s10 + $0x70] sm:$0xff] %v616_v44  ;;  %664 = vst [vmem:[%s1397_s10 + $0xf0] sm:$0xff] %v632_v45  ;;  %v617_v54 = vmax.f32 %v535_v46, 0.0  ;;  %v633_v55 = vmax.f32 %v599_v47, 0.0 }
 0x16c   : > { %646 = vst [vmem:[%s1397_s10 + $0x60] sm:$0xff] %v614_v50  ;;  %662 = vst [vmem:[%s1397_s10 + $0xe0] sm:$0xff] %v630_v51  ;;  %v615_v56 = vmax.f32 %v527_v52, 0.0  ;;  %v631_v57 = vmax.f32 %v591_v53, 0.0 }
 0x16d   : > { %649 = vst [vmem:[%s1397_s10 + $0x78] sm:$0xff] %v617_v54  ;;  %665 = vst [vmem:[%s1397_s10 + $0xf8] sm:$0xff] %v633_v55 }
 0x16e   : > { %647 = vst [vmem:[%s1397_s10 + $0x68] sm:$0xff] %v615_v56  ;;  %663 = vst [vmem:[%s1397_s10 + $0xe8] sm:$0xff] %v631_v57 }
 0x16f   : > { %1093 = shalt.err (!%p1090_p5)
}
 0x170   : > { %s1094_s29 = scalar_lea.hbm %s1454_s19, 4096  ;;  %s1098_s20 = scalar_lea.hbm %s1514_s3, 8192 }
 0x171   : > { %p1095_p9 = scmp.ne.s32.totalorder %s1454_s19, %s1094_s29  ;;  %p1099_p3 = scmp.lt.u32.totalorder %s1454_s19, %s1514_s3 }
 0x172   : > { %p1100_p7 = scmp.lt.u32.totalorder %s1098_s20, %s1094_s29  ;;  %p1102_p4 = scmp.lt.u32.totalorder %s1094_s29, %s1454_s19 }
 0x173   : > { %p1096_p1 = pnand %p1095_p9, %p1294_p10 }
 0x174   : > { %p1101_p13 = por %p1100_p7, %p1099_p3 }
 0x175   : > { %p1097_p2 = pneg %p1096_p1 }
 0x176   : > { %p1103_p6 = por %p1102_p4, %p1101_p13 }
 0x178   : > { %p1104_p8 = pnand %p1103_p6, %p1097_p2 }
 0x17a   : > { %1107 = shalt.err (!%p1104_p8)
}
 0x17b   : > { %s1173_s10 = smov 128   ;;  %s1174_s11 = smov 8  }
 0x17c   : > { %927 = dma.vmem_to_hbm [thread:$0]  (%p1294_p10), %s1456_s9, 4096, %s1454_s19, %s667_s25, %s1173_s10, %s1173_s10, %s1174_s11  }
 0x17d PF: > { %s696_s15 = sand.u32 1, %s1146_s12   ;;  %p1532_p12 = scmp.ne.s32.totalorder %s1522_s23, 0 }
 0x17e   : > { %p1533_p11 = scmp.ge.s32.totalorder %s1166_s17, 2  ;;  %s697_s18 = scalar_lea.sflag [#allocation4], %s696_s15 }
 0x180   : > { %p938_p0 = pnand %p1533_p11, %p1532_p12 }
 0x182   : > { %1141 = dma.done.wait (!%p938_p0), %s697_s18, 4096  }
 0x183   : > { %1143 = vsyncadd (!%p938_p0), %s697_s18, 4294963200  ;;  %s20_s17 = sadd.s32 1, %s1166_s17   ;;  %s1534_s12 = smov %s1150_s13 }
 0x184   : > { %p17_p5 = scmp.ge.s32.totalorder %s20_s17, 4   ;;  %s1535_s13 = smov %s1154_s14 }
 0x185   : > { %s1536_s14 = smov %s1303_s5  ;;  %s1537_s15 = smov %s1162_s16 }
 0x186   : > { %s1538_s16 = smov %s1540_s28  ;;  %19 = sbr.rel (!%p17_p5) target bundleno = 7 (0x7), region = 85 }
 0x18d   :  { %702 = vsyncpa [#allocation3], 1 }
 0x18e   :  { %704 = vsyncpa [#allocation3 + $0x1], 1 }
 0x18f   :  { %705 = vsyncpa [#allocation6], 1 }
 0x190   :  { %706 = vsyncpa [#allocation4], 1 }
 0x191   :  { %708 = vsyncpa [#allocation4 + $0x1], 1 }

</bundles_post_ra>
